<compile_context>
chip_gen: v5e
topology: v5e:2x2
jax: 0.10.0
libtpu: 0.0.40
codegen_flags: <defaults>
</compile_context>

<pallas_src>
import jax
import jax.numpy as jnp
from jax.experimental import pallas as pl
from jax.experimental.pallas import tpu as pltpu

EPS = 1e-5
VMEM_LIMIT = 64 * 1024 * 1024        # scoped-VMEM budget (<= physical on v5e/v6e/v7x)
STEP_VMEM_BUDGET = 16 * 1024 * 1024  # target per-grid-step working set (2 cores fit on v7x)


# ---------------------------------------------------------------------------
# pass 1: conv1 (3x3) + folded 1x1 shortcut, per-tile BN partial statistics
# ---------------------------------------------------------------------------
def _conv1_shortcut_kernel(x_ref, w1_ref,        # inputs  (x lane-dense, banded weight)
                           y1_ref, st_ref,       # outputs (y1 lane-dense, stacked stats)
                           xpad_s):              # VMEM scratch (vertical pad only)
    nb, H, WCin = x_ref.shape
    WC = y1_ref.shape[-1]                        # = W * Cout (lane-dense)

    # vertical zero padding only: two full-lane halo-row stores, interior overwritten
    zrow = jnp.zeros((nb, 1, WCin), jnp.float32)
    xpad_s[:, 0:1, :] = zrow
    xpad_s[:, H + 1:H + 2, :] = zrow
    xpad_s[:, 1:H + 1, :] = x_ref[...]

    # lane-dense "im2col": K = 3*W*Cin, each block a full-width padded row window
    lhs = jnp.concatenate(
        [xpad_s[:, ky:ky + H, :].reshape(nb * H, WCin) for ky in range(3)], axis=1)

    # ONE matmul: conv1 (all 9 taps via the banded weight) + 1x1 shortcut columns
    y = jnp.dot(lhs, w1_ref[...], preferred_element_type=jnp.float32)  # (nb*H, 2*WC)
    y1 = y[:, :WC]
    ys = y[:, WC:]                               # shortcut: stats only, no HBM store

    # BN partial stats: single lane-dense store (per-channel reduction over the width
    # axis is finished in the wrapper)
    st = jnp.concatenate(
        [jnp.sum(y1, axis=0, keepdims=True),
         jnp.sum(y1 * y1, axis=0, keepdims=True),
         jnp.sum(ys, axis=0, keepdims=True),
         jnp.sum(ys * ys, axis=0, keepdims=True)], axis=0)
    st_ref[...] = st.reshape(1, 4, WC)

    y1_ref[...] = y1.reshape(nb, H, WC)          # full-128-lane store


# ---------------------------------------------------------------------------
# pass 2: bn1 + relu + conv2 (3x3), per-tile BN partial statistics
# ---------------------------------------------------------------------------
def _bn1_relu_conv2_kernel(y1_ref, sc1_ref, sh1_ref, w2_ref,   # inputs
                           y2_ref, st_ref,                     # outputs
                           apad_s):                            # VMEM scratch
    nb, H, WC = y1_ref.shape

    # bn1 + relu in the lane-dense layout (scale/shift pre-tiled to W*Cout lanes)
    a1 = jnp.maximum(y1_ref[...] * sc1_ref[...] + sh1_ref[...], 0.0)

    zrow = jnp.zeros((nb, 1, WC), jnp.float32)
    apad_s[:, 0:1, :] = zrow
    apad_s[:, H + 1:H + 2, :] = zrow
    apad_s[:, 1:H + 1, :] = a1

    lhs = jnp.concatenate(
        [apad_s[:, ky:ky + H, :].reshape(nb * H, WC) for ky in range(3)], axis=1)

    y2 = jnp.dot(lhs, w2_ref[...], preferred_element_type=jnp.float32)  # (nb*H, WC)

    st = jnp.concatenate(
        [jnp.sum(y2, axis=0, keepdims=True),
         jnp.sum(y2 * y2, axis=0, keepdims=True)], axis=0)
    st_ref[...] = st.reshape(1, 2, WC)

    y2_ref[...] = y2.reshape(nb, H, WC)


# ---------------------------------------------------------------------------
# pass 3: bn2 + recomputed shortcut + bn_shortcut + residual add + relu
# ---------------------------------------------------------------------------
def _bn2_add_relu_kernel(y2_ref, x_ref, bs_ref, sc2_ref, sh2_ref, scs_ref, shs_ref,
                         o_ref):
    nb, H, WC = y2_ref.shape
    WCin = x_ref.shape[-1]
    # recompute the 1x1 shortcut (block-diagonal matmul) instead of an HBM round trip
    ys = jnp.dot(x_ref[...].reshape(nb * H, WCin), bs_ref[...],
                 preferred_element_type=jnp.float32).reshape(nb, H, WC)
    out = (y2_ref[...] * sc2_ref[...] + sh2_ref[...]
           + ys * scs_ref[...] + shs_ref[...])
    o_ref[...] = jnp.maximum(out, 0.0)


# ---------------------------------------------------------------------------
# wrapper helpers
# ---------------------------------------------------------------------------
def _bn_affine(s, q, count, gamma, beta):
    """Fold batch stats + BN affine into a single per-channel scale / shift."""
    mu = s / count
    var = q / count - mu * mu            # biased variance (PyTorch training-mode BN)
    scale = gamma * jax.lax.rsqrt(var + EPS)
    return scale, beta - mu * scale


def _shift_eyes(W):
    """(3, W, W) shift matrices: S[kx, xi, x] = 1 iff xi == x + kx - 1."""
    xi = jnp.arange(W)[:, None]
    x = jnp.arange(W)[None, :]
    return jnp.stack([(xi == x + kx - 1).astype(jnp.float32) for kx in range(3)])


def _banded_weight(w_row, S):
    """(3, Ci, Co) taps for one kernel row -> block-banded (W*Ci, W*Co) matmul weight.

    B[xi*Ci + c, x*Co + d] = w_row[xi - x + 1, c, d] for |xi - x| <= 1 else 0;
    the band clipping at xi in [0, W) encodes the horizontal zero padding."""
    Wd = S.shape[1]
    _, Ci, Co = w_row.shape
    return jnp.einsum("kij,kcd->icjd", S, w_row).reshape(Wd * Ci, Wd * Co)


def _blockdiag_weight(w_1x1, Wd):
    """(Ci, Co) 1x1-conv weight -> block-diagonal (W*Ci, W*Co) matmul weight."""
    Ci, Co = w_1x1.shape
    return jnp.einsum("ij,cd->icjd", jnp.eye(Wd, dtype=w_1x1.dtype),
                      w_1x1).reshape(Wd * Ci, Wd * Co)


def _choose_batch_block(N, H, W, Cout):
    """Largest images-per-step that fits the per-step VMEM budget and keeps T >= 2."""
    # f32 per-image working set of the heaviest pass (pass 2): double-buffered in/out
    # image tiles + vertical-pad scratch + the lane-dense K=3*W*C LHS temporary.
    per_image = 4 * (2 * H * W * Cout + 2 * H * W * Cout
                     + (H + 2) * W * Cout + 3 * H * W * Cout)
    nb = max(1, min(N, STEP_VMEM_BUDGET // per_image))
    if N >= 2:
        nb = min(nb, N // 2)     # >= 2 grid steps so both v7x TensorCores get work
    nb = max(nb, 1)
    while N % nb:                # grid must divide the batch exactly
        nb -= 1
    return nb


# ---------------------------------------------------------------------------
# wrapper
# ---------------------------------------------------------------------------
@jax.jit
def residual_block_forward(x_nchw, params):
    """PyTorch-equivalent ResidualBlock forward. x_nchw: (N, Cin, H, W) float32."""
    x = jnp.transpose(x_nchw, (0, 2, 3, 1))                 # NCHW -> NHWC
    N, H, W, Cin = x.shape
    Cout = params["w1"].shape[-1]
    WC, WCin = W * Cout, W * Cin
    count = N * H * W

    nb = _choose_batch_block(N, H, W, Cout)
    T = N // nb

    x_dense = x.reshape(N, H, WCin)                         # lane-dense input

    # precomputed banded / block-diagonal matmul weights (tiny, built once per jit)
    S = _shift_eyes(W)
    b1 = [_banded_weight(params["w1"][ky], S) for ky in range(3)]   # (W*Cin, W*Cout)
    b2 = [_banded_weight(params["w2"][ky], S) for ky in range(3)]   # (W*Cout, W*Cout)
    bs = _blockdiag_weight(params["ws"], W)                          # (W*Cin, W*Cout)
    zsc = jnp.zeros_like(bs)
    # pass-1 combined weight: rows = [ky0 | ky1 | ky2], cols = [conv1 | shortcut]
    w1_comb = jnp.concatenate(
        [jnp.concatenate([b1[0], zsc], axis=1),
         jnp.concatenate([b1[1], bs], axis=1),
         jnp.concatenate([b1[2], zsc], axis=1)], axis=0)             # (3*W*Cin, 2*W*Cout)
    w2_comb = jnp.concatenate(b2, axis=0)                            # (3*W*Cout, W*Cout)

    cparams = pltpu.CompilerParams(
        dimension_semantics=("parallel",),      # batch tiles independent -> megacore split
        vmem_limit_bytes=VMEM_LIMIT)

    def img_spec(last):                         # lane-dense (nb, H, W*C) image tile
        return pl.BlockSpec((nb, H, last), lambda i: (i, 0, 0))

    def full(a):                                # small un-tiled operand (weights)
        return pl.BlockSpec(a.shape, lambda i: (0,) * a.ndim)

    vec_spec = pl.BlockSpec((1, WC), lambda i: (0, 0))      # per-lane scale/shift row

    # ---- pass 1: conv1 + folded 1x1 shortcut, per-tile BN partial stats ----
    y1, st1 = pl.pallas_call(
        _conv1_shortcut_kernel,
        grid=(T,),
        in_specs=[img_spec(WCin), full(w1_comb)],
        out_specs=[img_spec(WC),
                   pl.BlockSpec((1, 4, WC), lambda i: (i, 0, 0))],
        out_shape=[jax.ShapeDtypeStruct((N, H, WC), jnp.float32),
                   jax.ShapeDtypeStruct((T, 4, WC), jnp.float32)],
        scratch_shapes=[pltpu.VMEM((nb, H + 2, WCin), jnp.float32)],
        compiler_params=cparams,
    )(x_dense, w1_comb)

    # finalize GLOBAL BN stats (tiny O(W*Cout) math between passes, plain JAX)
    st1_tot = jnp.sum(st1, axis=0).reshape(4, W, Cout).sum(axis=1)   # (4, Cout)
    scale1, shift1 = _bn_affine(st1_tot[0], st1_tot[1], count,
                                params["g1"].reshape(-1), params["be1"].reshape(-1))
    scale_s, shift_s = _bn_affine(st1_tot[2], st1_tot[3], count,
                                  params["gs"].reshape(-1), params["bes"].reshape(-1))

    def lane_tile(v):   # per-channel vector -> (1, W*Cout) matching channel-minor lanes
        return jnp.tile(v, (W,)).reshape(1, WC)

    # ---- pass 2: bn1 + relu + conv2, per-tile BN partial stats ----
    y2, st2 = pl.pallas_call(
        _bn1_relu_conv2_kernel,
        grid=(T,),
        in_specs=[img_spec(WC), vec_spec, vec_spec, full(w2_comb)],
        out_specs=[img_spec(WC),
                   pl.BlockSpec((1, 2, WC), lambda i: (i, 0, 0))],
        out_shape=[jax.ShapeDtypeStruct((N, H, WC), jnp.float32),
                   jax.ShapeDtypeStruct((T, 2, WC), jnp.float32)],
        scratch_shapes=[pltpu.VMEM((nb, H + 2, WC), jnp.float32)],
        compiler_params=cparams,
    )(y1, lane_tile(scale1), lane_tile(shift1), w2_comb)

    st2_tot = jnp.sum(st2, axis=0).reshape(2, W, Cout).sum(axis=1)
    scale2, shift2 = _bn_affine(st2_tot[0], st2_tot[1], count,
                                params["g2"].reshape(-1), params["be2"].reshape(-1))

    # ---- pass 3: bn2 + recomputed shortcut + bn_shortcut + add + relu ----
    out_dense = pl.pallas_call(
        _bn2_add_relu_kernel,
        grid=(T,),
        in_specs=[img_spec(WC), img_spec(WCin), full(bs),
                  vec_spec, vec_spec, vec_spec, vec_spec],
        out_specs=img_spec(WC),
        out_shape=jax.ShapeDtypeStruct((N, H, WC), jnp.float32),
        compiler_params=cparams,
    )(y2, x_dense, bs, lane_tile(scale2), lane_tile(shift2),
      lane_tile(scale_s), lane_tile(shift_s))

    out = out_dense.reshape(N, H, W, Cout)
    return jnp.transpose(out, (0, 3, 1, 2))                 # NHWC -> NCHW


# ---------------------------------------------------------------------------
# pure-JAX reference (matches the PyTorch module, training-mode BN, with biases)
# ---------------------------------------------------------------------------
def _reference_forward(x_nchw, p):
    x = jnp.transpose(x_nchw, (0, 2, 3, 1))

    def conv(y, w, b):
        out = jax.lax.conv_general_dilated(
            y, w, window_strides=(1, 1), padding="SAME",
            dimension_numbers=("NHWC", "HWIO", "NHWC"))
        return out + b.reshape(1, 1, 1, -1)

    def bn(y, g, be):
        mu = jnp.mean(y, axis=(0, 1, 2), keepdims=True)
        var = jnp.mean((y - mu) ** 2, axis=(0, 1, 2), keepdims=True)
        return (y - mu) * jax.lax.rsqrt(var + EPS) * g.reshape(1, 1, 1, -1) \
            + be.reshape(1, 1, 1, -1)

    out = jax.nn.relu(bn(conv(x, p["w1"], p["b1"]), p["g1"], p["be1"]))
    out = bn(conv(out, p["w2"], p["b2"]), p["g2"], p["be2"])
    cin, cout = p["ws"].shape
    sc = bn(conv(x, p["ws"].reshape(1, 1, cin, cout), p["bs"]), p["gs"], p["bes"])
    out = jax.nn.relu(out + sc)
    return jnp.transpose(out, (0, 3, 1, 2))


def make_params(key, in_channels, out_channels):
    ks = jax.random.split(key, 6)
    f32 = jnp.float32
    return {
        # conv weights in HWIO layout (PyTorch OIHW transposed to (kh, kw, Cin, Cout))
        "w1": 0.2 * jax.random.normal(ks[0], (3, 3, in_channels, out_channels), f32),
        "b1": 0.1 * jax.random.normal(ks[1], (1, out_channels), f32),
        "g1": jnp.ones((1, out_channels), f32),
        "be1": jnp.zeros((1, out_channels), f32),
        "w2": 0.2 * jax.random.normal(ks[2], (3, 3, out_channels, out_channels), f32),
        "b2": 0.1 * jax.random.normal(ks[3], (1, out_channels), f32),
        "g2": jnp.ones((1, out_channels), f32),
        "be2": jnp.zeros((1, out_channels), f32),
        # shortcut 1x1 conv (active because in_channels != out_channels)
        "ws": 0.2 * jax.random.normal(ks[4], (in_channels, out_channels), f32),
        "bs": 0.1 * jax.random.normal(ks[5], (1, out_channels), f32),
        "gs": jnp.ones((1, out_channels), f32),
        "bes": jnp.zeros((1, out_channels), f32),
    }


if __name__ == "__main__":
    # ResidualBlock(in_channels=4, out_channels=8, kernel_size=3, stride=1)
    N, Cin, H, W = 2, 4, 16, 16
    Cout = 8

    key = jax.random.PRNGKey(0)
    k_x, k_p = jax.random.split(key)
    x = jax.random.normal(k_x, (N, Cin, H, W), jnp.float32)
    params = make_params(k_p, Cin, Cout)

    out = residual_block_forward(x, params)
    out = jax.block_until_ready(out)

    ref = _reference_forward(x, params)
    assert out.shape == (N, Cout, H, W), out.shape
    assert bool(jnp.allclose(out, ref, atol=1e-4, rtol=1e-4)), \
        "Pallas kernel does not match JAX reference"

    print("KERNEL_OK")
</pallas_src>

<mosaic_0001>
module attributes {stable_mosaic.version = 11 : i64} {
  func.func @_conv1_shortcut_kernel(%arg0: i32, %arg1: memref<1x16x64xf32, #tpu.memory_space<vmem>>, %arg2: memref<192x256xf32, #tpu.memory_space<vmem>>, %arg3: memref<1x16x128xf32, #tpu.memory_space<vmem>>, %arg4: memref<1x4x128xf32, #tpu.memory_space<vmem>>, %arg5: memref<1x18x64xf32, #tpu.memory_space<vmem>>) attributes {dimension_semantics = [#tpu.dimension_semantics<parallel>], iteration_bounds = array<i64: 2>, scalar_prefetch = 0 : i64, scratch_operands = 1 : i64, tpu.core_type = #tpu.core_type<tc>, window_params = [{transform_indices = @transform_0, window_bounds = array<i64: 1, 16, 64>}, {pipeline_mode = #tpu.pipeline_mode<synchronous>, transform_indices = @transform_1, window_bounds = array<i64: 192, 256>}, {transform_indices = @transform_2, window_bounds = array<i64: 1, 16, 128>}, {transform_indices = @transform_3, window_bounds = array<i64: 1, 4, 128>}]} {
    %cst = arith.constant 0.000000e+00 : f32
    %0 = vector.broadcast %cst : f32 to vector<1x1x64xf32>
    %c0 = arith.constant 0 : index
    %c0_0 = arith.constant 0 : index
    %c0_1 = arith.constant 0 : index
    %1 = vector.load %arg5[%c0, %c0_0, %c0_1] : memref<1x18x64xf32, #tpu.memory_space<vmem>>, vector<1x1x64xf32>
    tpu.vector_store %arg5[%c0, %c0_0, %c0_1], %0 {strides = array<i32>} : memref<1x18x64xf32, #tpu.memory_space<vmem>>, vector<1x1x64xf32>,
    %c0_2 = arith.constant 0 : index
    %c17 = arith.constant 17 : index
    %c0_3 = arith.constant 0 : index
    %2 = vector.load %arg5[%c0_2, %c17, %c0_3] : memref<1x18x64xf32, #tpu.memory_space<vmem>>, vector<1x1x64xf32>
    tpu.vector_store %arg5[%c0_2, %c17, %c0_3], %0 {strides = array<i32>} : memref<1x18x64xf32, #tpu.memory_space<vmem>>, vector<1x1x64xf32>,
    %c0_4 = arith.constant 0 : index
    %c0_5 = arith.constant 0 : index
    %c0_6 = arith.constant 0 : index
    %3 = vector.load %arg1[%c0_4, %c0_5, %c0_6] : memref<1x16x64xf32, #tpu.memory_space<vmem>>, vector<1x16x64xf32>
    %c0_7 = arith.constant 0 : index
    %c1 = arith.constant 1 : index
    %c0_8 = arith.constant 0 : index
    %4 = vector.load %arg5[%c0_7, %c1, %c0_8] : memref<1x18x64xf32, #tpu.memory_space<vmem>>, vector<1x16x64xf32>
    tpu.vector_store %arg5[%c0_7, %c1, %c0_8], %3 {strides = array<i32>} : memref<1x18x64xf32, #tpu.memory_space<vmem>>, vector<1x16x64xf32>,
    %c0_9 = arith.constant 0 : index
    %c0_10 = arith.constant 0 : index
    %c0_11 = arith.constant 0 : index
    %5 = vector.load %arg5[%c0_9, %c0_10, %c0_11] : memref<1x18x64xf32, #tpu.memory_space<vmem>>, vector<1x16x64xf32>
    %6 = vector.shape_cast %5 : vector<1x16x64xf32> to vector<16x64xf32>
    %c0_12 = arith.constant 0 : index
    %c1_13 = arith.constant 1 : index
    %c0_14 = arith.constant 0 : index
    %7 = vector.load %arg5[%c0_12, %c1_13, %c0_14] : memref<1x18x64xf32, #tpu.memory_space<vmem>>, vector<1x16x64xf32>
    %8 = vector.shape_cast %7 : vector<1x16x64xf32> to vector<16x64xf32>
    %c0_15 = arith.constant 0 : index
    %c2 = arith.constant 2 : index
    %c0_16 = arith.constant 0 : index
    %9 = vector.load %arg5[%c0_15, %c2, %c0_16] : memref<1x18x64xf32, #tpu.memory_space<vmem>>, vector<1x16x64xf32>
    %10 = vector.shape_cast %9 : vector<1x16x64xf32> to vector<16x64xf32>
    %11 = tpu.concatenate %6, %8, %10 in 1 : vector<16x64xf32>, vector<16x64xf32>, vector<16x64xf32> -> vector<16x192xf32>
    %c0_17 = arith.constant 0 : index
    %c0_18 = arith.constant 0 : index
    %12 = vector.load %arg2[%c0_17, %c0_18] : memref<192x256xf32, #tpu.memory_space<vmem>>, vector<192x256xf32>
    %cst_19 = arith.constant dense<0.000000e+00> : vector<16x256xf32>
    %13 = tpu.matmul %11, %12, %cst_19 {dimension_numbers = #tpu.dot_dimension_numbers<[1], [0], [0], [1], [0, 0, 1, 1], [], []>} : vector<16x192xf32>, vector<192x256xf32>, vector<16x256xf32> -> vector<16x256xf32>
    %14 = vector.extract_strided_slice %13 {offsets = [0, 0], sizes = [16, 128], strides = [1, 1]} : vector<16x256xf32> to vector<16x128xf32>
    %15 = vector.extract_strided_slice %13 {offsets = [0, 128], sizes = [16, 128], strides = [1, 1]} : vector<16x256xf32> to vector<16x128xf32>
    %cst_20 = arith.constant dense<0.000000e+00> : vector<128xf32>
    %16 = vector.multi_reduction <add>, %14, %cst_20 [0] : vector<16x128xf32> to vector<128xf32>
    %17 = vector.shape_cast %16 : vector<128xf32> to vector<1x128xf32>
    %18 = arith.mulf %14, %14 : vector<16x128xf32>
    %cst_21 = arith.constant dense<0.000000e+00> : vector<128xf32>
    %19 = vector.multi_reduction <add>, %18, %cst_21 [0] : vector<16x128xf32> to vector<128xf32>
    %20 = vector.shape_cast %19 : vector<128xf32> to vector<1x128xf32>
    %cst_22 = arith.constant dense<0.000000e+00> : vector<128xf32>
    %21 = vector.multi_reduction <add>, %15, %cst_22 [0] : vector<16x128xf32> to vector<128xf32>
    %22 = vector.shape_cast %21 : vector<128xf32> to vector<1x128xf32>
    %23 = arith.mulf %15, %15 : vector<16x128xf32>
    %cst_23 = arith.constant dense<0.000000e+00> : vector<128xf32>
    %24 = vector.multi_reduction <add>, %23, %cst_23 [0] : vector<16x128xf32> to vector<128xf32>
    %25 = vector.shape_cast %24 : vector<128xf32> to vector<1x128xf32>
    %26 = tpu.concatenate %17, %20, %22, %25 in 0 : vector<1x128xf32>, vector<1x128xf32>, vector<1x128xf32>, vector<1x128xf32> -> vector<4x128xf32>
    %27 = vector.shape_cast %26 : vector<4x128xf32> to vector<1x4x128xf32>
    %c0_24 = arith.constant 0 : index
    %c0_25 = arith.constant 0 : index
    %c0_26 = arith.constant 0 : index
    %28 = vector.load %arg4[%c0_24, %c0_25, %c0_26] : memref<1x4x128xf32, #tpu.memory_space<vmem>>, vector<1x4x128xf32>
    tpu.vector_store %arg4[%c0_24, %c0_25, %c0_26], %27 {strides = array<i32>} : memref<1x4x128xf32, #tpu.memory_space<vmem>>, vector<1x4x128xf32>,
    %29 = vector.shape_cast %14 : vector<16x128xf32> to vector<1x16x128xf32>
    %c0_27 = arith.constant 0 : index
    %c0_28 = arith.constant 0 : index
    %c0_29 = arith.constant 0 : index
    %30 = vector.load %arg3[%c0_27, %c0_28, %c0_29] : memref<1x16x128xf32, #tpu.memory_space<vmem>>, vector<1x16x128xf32>
    tpu.vector_store %arg3[%c0_27, %c0_28, %c0_29], %29 {strides = array<i32>} : memref<1x16x128xf32, #tpu.memory_space<vmem>>, vector<1x16x128xf32>,
    return
  }
  func.func @transform_0(%arg0: i32) -> (i32, i32, i32) {
    %c0_i32 = arith.constant 0 : i32
    %c0_i32_0 = arith.constant 0 : i32
    %c0_i32_1 = arith.constant 0 : i32
    return %arg0, %c0_i32, %c0_i32_0 : i32, i32, i32
  }
  func.func @transform_1(%arg0: i32) -> (i32, i32) {
    %c0_i32 = arith.constant 0 : i32
    %c0_i32_0 = arith.constant 0 : i32
    %c0_i32_1 = arith.constant 0 : i32
    return %c0_i32, %c0_i32_0 : i32, i32
  }
  func.func @transform_2(%arg0: i32) -> (i32, i32, i32) {
    %c0_i32 = arith.constant 0 : i32
    %c0_i32_0 = arith.constant 0 : i32
    %c0_i32_1 = arith.constant 0 : i32
    return %arg0, %c0_i32, %c0_i32_0 : i32, i32, i32
  }
  func.func @transform_3(%arg0: i32) -> (i32, i32, i32) {
    %c0_i32 = arith.constant 0 : i32
    %c0_i32_0 = arith.constant 0 : i32
    %c0_i32_1 = arith.constant 0 : i32
    return %arg0, %c0_i32, %c0_i32_0 : i32, i32, i32
  }
}

module attributes {stable_mosaic.version = 11 : i64} {
  func.func @_bn1_relu_conv2_kernel(%arg0: i32, %arg1: memref<1x16x128xf32, #tpu.memory_space<vmem>>, %arg2: memref<1x128xf32, #tpu.memory_space<vmem>>, %arg3: memref<1x128xf32, #tpu.memory_space<vmem>>, %arg4: memref<384x128xf32, #tpu.memory_space<vmem>>, %arg5: memref<1x16x128xf32, #tpu.memory_space<vmem>>, %arg6: memref<1x2x128xf32, #tpu.memory_space<vmem>>, %arg7: memref<1x18x128xf32, #tpu.memory_space<vmem>>) attributes {dimension_semantics = [#tpu.dimension_semantics<parallel>], iteration_bounds = array<i64: 2>, scalar_prefetch = 0 : i64, scratch_operands = 1 : i64, tpu.core_type = #tpu.core_type<tc>, window_params = [{transform_indices = @transform_0, window_bounds = array<i64: 1, 16, 128>}, {pipeline_mode = #tpu.pipeline_mode<synchronous>, transform_indices = @transform_1, window_bounds = array<i64: 1, 128>}, {pipeline_mode = #tpu.pipeline_mode<synchronous>, transform_indices = @transform_2, window_bounds = array<i64: 1, 128>}, {pipeline_mode = #tpu.pipeline_mode<synchronous>, transform_indices = @transform_3, window_bounds = array<i64: 384, 128>}, {transform_indices = @transform_4, window_bounds = array<i64: 1, 16, 128>}, {transform_indices = @transform_5, window_bounds = array<i64: 1, 2, 128>}]} {
    %c0 = arith.constant 0 : index
    %c0_0 = arith.constant 0 : index
    %c0_1 = arith.constant 0 : index
    %0 = vector.load %arg1[%c0, %c0_0, %c0_1] : memref<1x16x128xf32, #tpu.memory_space<vmem>>, vector<1x16x128xf32>
    %c0_2 = arith.constant 0 : index
    %c0_3 = arith.constant 0 : index
    %1 = vector.load %arg2[%c0_2, %c0_3] : memref<1x128xf32, #tpu.memory_space<vmem>>, vector<1x128xf32>
    %2 = vector.shape_cast %1 : vector<1x128xf32> to vector<1x1x128xf32>
    %3 = vector.broadcast %2 : vector<1x1x128xf32> to vector<1x16x128xf32>
    %4 = arith.mulf %0, %3 : vector<1x16x128xf32>
    %c0_4 = arith.constant 0 : index
    %c0_5 = arith.constant 0 : index
    %5 = vector.load %arg3[%c0_4, %c0_5] : memref<1x128xf32, #tpu.memory_space<vmem>>, vector<1x128xf32>
    %6 = vector.shape_cast %5 : vector<1x128xf32> to vector<1x1x128xf32>
    %7 = vector.broadcast %6 : vector<1x1x128xf32> to vector<1x16x128xf32>
    %8 = arith.addf %4, %7 : vector<1x16x128xf32>
    %cst = arith.constant 0.000000e+00 : f32
    %9 = vector.broadcast %cst : f32 to vector<1x16x128xf32>
    %10 = arith.maximumf %8, %9 : vector<1x16x128xf32>
    %cst_6 = arith.constant 0.000000e+00 : f32
    %11 = vector.broadcast %cst_6 : f32 to vector<1x1x128xf32>
    %c0_7 = arith.constant 0 : index
    %c0_8 = arith.constant 0 : index
    %c0_9 = arith.constant 0 : index
    %12 = vector.load %arg7[%c0_7, %c0_8, %c0_9] : memref<1x18x128xf32, #tpu.memory_space<vmem>>, vector<1x1x128xf32>
    tpu.vector_store %arg7[%c0_7, %c0_8, %c0_9], %11 {strides = array<i32>} : memref<1x18x128xf32, #tpu.memory_space<vmem>>, vector<1x1x128xf32>,
    %c0_10 = arith.constant 0 : index
    %c17 = arith.constant 17 : index
    %c0_11 = arith.constant 0 : index
    %13 = vector.load %arg7[%c0_10, %c17, %c0_11] : memref<1x18x128xf32, #tpu.memory_space<vmem>>, vector<1x1x128xf32>
    tpu.vector_store %arg7[%c0_10, %c17, %c0_11], %11 {strides = array<i32>} : memref<1x18x128xf32, #tpu.memory_space<vmem>>, vector<1x1x128xf32>,
    %c0_12 = arith.constant 0 : index
    %c1 = arith.constant 1 : index
    %c0_13 = arith.constant 0 : index
    %14 = vector.load %arg7[%c0_12, %c1, %c0_13] : memref<1x18x128xf32, #tpu.memory_space<vmem>>, vector<1x16x128xf32>
    tpu.vector_store %arg7[%c0_12, %c1, %c0_13], %10 {strides = array<i32>} : memref<1x18x128xf32, #tpu.memory_space<vmem>>, vector<1x16x128xf32>,
    %c0_14 = arith.constant 0 : index
    %c0_15 = arith.constant 0 : index
    %c0_16 = arith.constant 0 : index
    %15 = vector.load %arg7[%c0_14, %c0_15, %c0_16] : memref<1x18x128xf32, #tpu.memory_space<vmem>>, vector<1x16x128xf32>
    %16 = vector.shape_cast %15 : vector<1x16x128xf32> to vector<16x128xf32>
    %c0_17 = arith.constant 0 : index
    %c1_18 = arith.constant 1 : index
    %c0_19 = arith.constant 0 : index
    %17 = vector.load %arg7[%c0_17, %c1_18, %c0_19] : memref<1x18x128xf32, #tpu.memory_space<vmem>>, vector<1x16x128xf32>
    %18 = vector.shape_cast %17 : vector<1x16x128xf32> to vector<16x128xf32>
    %c0_20 = arith.constant 0 : index
    %c2 = arith.constant 2 : index
    %c0_21 = arith.constant 0 : index
    %19 = vector.load %arg7[%c0_20, %c2, %c0_21] : memref<1x18x128xf32, #tpu.memory_space<vmem>>, vector<1x16x128xf32>
    %20 = vector.shape_cast %19 : vector<1x16x128xf32> to vector<16x128xf32>
    %21 = tpu.concatenate %16, %18, %20 in 1 : vector<16x128xf32>, vector<16x128xf32>, vector<16x128xf32> -> vector<16x384xf32>
    %c0_22 = arith.constant 0 : index
    %c0_23 = arith.constant 0 : index
    %22 = vector.load %arg4[%c0_22, %c0_23] : memref<384x128xf32, #tpu.memory_space<vmem>>, vector<384x128xf32>
    %cst_24 = arith.constant dense<0.000000e+00> : vector<16x128xf32>
    %23 = tpu.matmul %21, %22, %cst_24 {dimension_numbers = #tpu.dot_dimension_numbers<[1], [0], [0], [1], [0, 0, 1, 1], [], []>} : vector<16x384xf32>, vector<384x128xf32>, vector<16x128xf32> -> vector<16x128xf32>
    %cst_25 = arith.constant dense<0.000000e+00> : vector<128xf32>
    %24 = vector.multi_reduction <add>, %23, %cst_25 [0] : vector<16x128xf32> to vector<128xf32>
    %25 = vector.shape_cast %24 : vector<128xf32> to vector<1x128xf32>
    %26 = arith.mulf %23, %23 : vector<16x128xf32>
    %cst_26 = arith.constant dense<0.000000e+00> : vector<128xf32>
    %27 = vector.multi_reduction <add>, %26, %cst_26 [0] : vector<16x128xf32> to vector<128xf32>
    %28 = vector.shape_cast %27 : vector<128xf32> to vector<1x128xf32>
    %29 = tpu.concatenate %25, %28 in 0 : vector<1x128xf32>, vector<1x128xf32> -> vector<2x128xf32>
    %30 = vector.shape_cast %29 : vector<2x128xf32> to vector<1x2x128xf32>
    %c0_27 = arith.constant 0 : index
    %c0_28 = arith.constant 0 : index
    %c0_29 = arith.constant 0 : index
    %31 = vector.load %arg6[%c0_27, %c0_28, %c0_29] : memref<1x2x128xf32, #tpu.memory_space<vmem>>, vector<1x2x128xf32>
    tpu.vector_store %arg6[%c0_27, %c0_28, %c0_29], %30 {strides = array<i32>} : memref<1x2x128xf32, #tpu.memory_space<vmem>>, vector<1x2x128xf32>,
    %32 = vector.shape_cast %23 : vector<16x128xf32> to vector<1x16x128xf32>
    %c0_30 = arith.constant 0 : index
    %c0_31 = arith.constant 0 : index
    %c0_32 = arith.constant 0 : index
    %33 = vector.load %arg5[%c0_30, %c0_31, %c0_32] : memref<1x16x128xf32, #tpu.memory_space<vmem>>, vector<1x16x128xf32>
    tpu.vector_store %arg5[%c0_30, %c0_31, %c0_32], %32 {strides = array<i32>} : memref<1x16x128xf32, #tpu.memory_space<vmem>>, vector<1x16x128xf32>,
    return
  }
  func.func @transform_0(%arg0: i32) -> (i32, i32, i32) {
    %c0_i32 = arith.constant 0 : i32
    %c0_i32_0 = arith.constant 0 : i32
    %c0_i32_1 = arith.constant 0 : i32
    return %arg0, %c0_i32, %c0_i32_0 : i32, i32, i32
  }
  func.func @transform_1(%arg0: i32) -> (i32, i32) {
    %c0_i32 = arith.constant 0 : i32
    %c0_i32_0 = arith.constant 0 : i32
    %c0_i32_1 = arith.constant 0 : i32
    return %c0_i32, %c0_i32_0 : i32, i32
  }
  func.func @transform_2(%arg0: i32) -> (i32, i32) {
    %c0_i32 = arith.constant 0 : i32
    %c0_i32_0 = arith.constant 0 : i32
    %c0_i32_1 = arith.constant 0 : i32
    return %c0_i32, %c0_i32_0 : i32, i32
  }
  func.func @transform_3(%arg0: i32) -> (i32, i32) {
    %c0_i32 = arith.constant 0 : i32
    %c0_i32_0 = arith.constant 0 : i32
    %c0_i32_1 = arith.constant 0 : i32
    return %c0_i32, %c0_i32_0 : i32, i32
  }
  func.func @transform_4(%arg0: i32) -> (i32, i32, i32) {
    %c0_i32 = arith.constant 0 : i32
    %c0_i32_0 = arith.constant 0 : i32
    %c0_i32_1 = arith.constant 0 : i32
    return %arg0, %c0_i32, %c0_i32_0 : i32, i32, i32
  }
  func.func @transform_5(%arg0: i32) -> (i32, i32, i32) {
    %c0_i32 = arith.constant 0 : i32
    %c0_i32_0 = arith.constant 0 : i32
    %c0_i32_1 = arith.constant 0 : i32
    return %arg0, %c0_i32, %c0_i32_0 : i32, i32, i32
  }
}

module attributes {stable_mosaic.version = 11 : i64} {
  func.func @_bn2_add_relu_kernel(%arg0: i32, %arg1: memref<1x16x128xf32, #tpu.memory_space<vmem>>, %arg2: memref<1x16x64xf32, #tpu.memory_space<vmem>>, %arg3: memref<64x128xf32, #tpu.memory_space<vmem>>, %arg4: memref<1x128xf32, #tpu.memory_space<vmem>>, %arg5: memref<1x128xf32, #tpu.memory_space<vmem>>, %arg6: memref<1x128xf32, #tpu.memory_space<vmem>>, %arg7: memref<1x128xf32, #tpu.memory_space<vmem>>, %arg8: memref<1x16x128xf32, #tpu.memory_space<vmem>>) attributes {dimension_semantics = [#tpu.dimension_semantics<parallel>], iteration_bounds = array<i64: 2>, scalar_prefetch = 0 : i64, scratch_operands = 0 : i64, tpu.core_type = #tpu.core_type<tc>, window_params = [{transform_indices = @transform_0, window_bounds = array<i64: 1, 16, 128>}, {transform_indices = @transform_1, window_bounds = array<i64: 1, 16, 64>}, {pipeline_mode = #tpu.pipeline_mode<synchronous>, transform_indices = @transform_2, window_bounds = array<i64: 64, 128>}, {pipeline_mode = #tpu.pipeline_mode<synchronous>, transform_indices = @transform_3, window_bounds = array<i64: 1, 128>}, {pipeline_mode = #tpu.pipeline_mode<synchronous>, transform_indices = @transform_4, window_bounds = array<i64: 1, 128>}, {pipeline_mode = #tpu.pipeline_mode<synchronous>, transform_indices = @transform_5, window_bounds = array<i64: 1, 128>}, {pipeline_mode = #tpu.pipeline_mode<synchronous>, transform_indices = @transform_6, window_bounds = array<i64: 1, 128>}, {transform_indices = @transform_7, window_bounds = array<i64: 1, 16, 128>}]} {
    %c0 = arith.constant 0 : index
    %c0_0 = arith.constant 0 : index
    %c0_1 = arith.constant 0 : index
    %0 = vector.load %arg2[%c0, %c0_0, %c0_1] : memref<1x16x64xf32, #tpu.memory_space<vmem>>, vector<1x16x64xf32>
    %1 = vector.shape_cast %0 : vector<1x16x64xf32> to vector<16x64xf32>
    %c0_2 = arith.constant 0 : index
    %c0_3 = arith.constant 0 : index
    %2 = vector.load %arg3[%c0_2, %c0_3] : memref<64x128xf32, #tpu.memory_space<vmem>>, vector<64x128xf32>
    %cst = arith.constant dense<0.000000e+00> : vector<16x128xf32>
    %3 = tpu.matmul %1, %2, %cst {dimension_numbers = #tpu.dot_dimension_numbers<[1], [0], [0], [1], [0, 0, 1, 1], [], []>} : vector<16x64xf32>, vector<64x128xf32>, vector<16x128xf32> -> vector<16x128xf32>
    %4 = vector.shape_cast %3 : vector<16x128xf32> to vector<1x16x128xf32>
    %c0_4 = arith.constant 0 : index
    %c0_5 = arith.constant 0 : index
    %c0_6 = arith.constant 0 : index
    %5 = vector.load %arg1[%c0_4, %c0_5, %c0_6] : memref<1x16x128xf32, #tpu.memory_space<vmem>>, vector<1x16x128xf32>
    %c0_7 = arith.constant 0 : index
    %c0_8 = arith.constant 0 : index
    %6 = vector.load %arg4[%c0_7, %c0_8] : memref<1x128xf32, #tpu.memory_space<vmem>>, vector<1x128xf32>
    %7 = vector.shape_cast %6 : vector<1x128xf32> to vector<1x1x128xf32>
    %8 = vector.broadcast %7 : vector<1x1x128xf32> to vector<1x16x128xf32>
    %9 = arith.mulf %5, %8 : vector<1x16x128xf32>
    %c0_9 = arith.constant 0 : index
    %c0_10 = arith.constant 0 : index
    %10 = vector.load %arg5[%c0_9, %c0_10] : memref<1x128xf32, #tpu.memory_space<vmem>>, vector<1x128xf32>
    %11 = vector.shape_cast %10 : vector<1x128xf32> to vector<1x1x128xf32>
    %12 = vector.broadcast %11 : vector<1x1x128xf32> to vector<1x16x128xf32>
    %13 = arith.addf %9, %12 : vector<1x16x128xf32>
    %c0_11 = arith.constant 0 : index
    %c0_12 = arith.constant 0 : index
    %14 = vector.load %arg6[%c0_11, %c0_12] : memref<1x128xf32, #tpu.memory_space<vmem>>, vector<1x128xf32>
    %15 = vector.shape_cast %14 : vector<1x128xf32> to vector<1x1x128xf32>
    %16 = vector.broadcast %15 : vector<1x1x128xf32> to vector<1x16x128xf32>
    %17 = arith.mulf %4, %16 : vector<1x16x128xf32>
    %18 = arith.addf %13, %17 : vector<1x16x128xf32>
    %c0_13 = arith.constant 0 : index
    %c0_14 = arith.constant 0 : index
    %19 = vector.load %arg7[%c0_13, %c0_14] : memref<1x128xf32, #tpu.memory_space<vmem>>, vector<1x128xf32>
    %20 = vector.shape_cast %19 : vector<1x128xf32> to vector<1x1x128xf32>
    %21 = vector.broadcast %20 : vector<1x1x128xf32> to vector<1x16x128xf32>
    %22 = arith.addf %18, %21 : vector<1x16x128xf32>
    %cst_15 = arith.constant 0.000000e+00 : f32
    %23 = vector.broadcast %cst_15 : f32 to vector<1x16x128xf32>
    %24 = arith.maximumf %22, %23 : vector<1x16x128xf32>
    %c0_16 = arith.constant 0 : index
    %c0_17 = arith.constant 0 : index
    %c0_18 = arith.constant 0 : index
    %25 = vector.load %arg8[%c0_16, %c0_17, %c0_18] : memref<1x16x128xf32, #tpu.memory_space<vmem>>, vector<1x16x128xf32>
    tpu.vector_store %arg8[%c0_16, %c0_17, %c0_18], %24 {strides = array<i32>} : memref<1x16x128xf32, #tpu.memory_space<vmem>>, vector<1x16x128xf32>,
    return
  }
  func.func @transform_0(%arg0: i32) -> (i32, i32, i32) {
    %c0_i32 = arith.constant 0 : i32
    %c0_i32_0 = arith.constant 0 : i32
    %c0_i32_1 = arith.constant 0 : i32
    return %arg0, %c0_i32, %c0_i32_0 : i32, i32, i32
  }
  func.func @transform_1(%arg0: i32) -> (i32, i32, i32) {
    %c0_i32 = arith.constant 0 : i32
    %c0_i32_0 = arith.constant 0 : i32
    %c0_i32_1 = arith.constant 0 : i32
    return %arg0, %c0_i32, %c0_i32_0 : i32, i32, i32
  }
  func.func @transform_2(%arg0: i32) -> (i32, i32) {
    %c0_i32 = arith.constant 0 : i32
    %c0_i32_0 = arith.constant 0 : i32
    %c0_i32_1 = arith.constant 0 : i32
    return %c0_i32, %c0_i32_0 : i32, i32
  }
  func.func @transform_3(%arg0: i32) -> (i32, i32) {
    %c0_i32 = arith.constant 0 : i32
    %c0_i32_0 = arith.constant 0 : i32
    %c0_i32_1 = arith.constant 0 : i32
    return %c0_i32, %c0_i32_0 : i32, i32
  }
  func.func @transform_4(%arg0: i32) -> (i32, i32) {
    %c0_i32 = arith.constant 0 : i32
    %c0_i32_0 = arith.constant 0 : i32
    %c0_i32_1 = arith.constant 0 : i32
    return %c0_i32, %c0_i32_0 : i32, i32
  }
  func.func @transform_5(%arg0: i32) -> (i32, i32) {
    %c0_i32 = arith.constant 0 : i32
    %c0_i32_0 = arith.constant 0 : i32
    %c0_i32_1 = arith.constant 0 : i32
    return %c0_i32, %c0_i32_0 : i32, i32
  }
  func.func @transform_6(%arg0: i32) -> (i32, i32) {
    %c0_i32 = arith.constant 0 : i32
    %c0_i32_0 = arith.constant 0 : i32
    %c0_i32_1 = arith.constant 0 : i32
    return %c0_i32, %c0_i32_0 : i32, i32
  }
  func.func @transform_7(%arg0: i32) -> (i32, i32, i32) {
    %c0_i32 = arith.constant 0 : i32
    %c0_i32_0 = arith.constant 0 : i32
    %c0_i32_1 = arith.constant 0 : i32
    return %arg0, %c0_i32, %c0_i32_0 : i32, i32, i32
  }
}

</mosaic_0001>

<bundles_post_ra>
// kernel: tile.33
= control target key start
LH: loop header
LB: loop body
LE: loop exit
PB: predicated region body
PF: predicated region fallthrough
CT: control target
= control target key end

     0   :  { %s28_s0 = inlined_call_operand.vmem [shape: f32[8], index: 0, kind: input, shape index: {}]   ;;  %s29_s1 = inlined_call_operand.vmem [shape: f32[16,8], index: 1, kind: output, shape index: {}]  }
   0x1   :  { %v4_v0 = vld [vmem:[%s28_s0] ss:$0 sm:$0xff] }
   0x2   :  { %5 = vst [vmem:[%s29_s1] sm:$0xff] %v4_v0 }
   0x3   :  { %8 = vst [vmem:[%s29_s1 + $0x8] sm:$0xff] %v4_v0 }

// kernel: tile.34
= control target key start
LH: loop header
LB: loop body
LE: loop exit
PB: predicated region body
PF: predicated region fallthrough
CT: control target
= control target key end

     0   :  { %s131_s10 = smov 120   ;;  %s132_s11 = smov 104   ;;  %vm3_vm0 = vcmask 64512   ;;  %vm9_vm1 = vcmask 1048512   ;;  %vm15_vm2 = vcmask 982912   ;;  %vm21_vm3 = vcmask 917312   ;;  %s207_s0 = inlined_call_operand.vmem [shape: f32[16,8], index: 0, kind: input, shape index: {}]   ;;  %s208_s1 = inlined_call_operand.vmem [shape: f32[1,128], index: 1, kind: output, shape index: {}]  }
   0x1   :  { %v101_v0 = vld [vmem:[%s207_s0 + $0xf] sm:$0x1]   ;;  %v103_v1 = vld [vmem:[%s207_s0 + $0xd] sm:$0x1]   ;;  %v105_v2 = vld [vmem:[%s207_s0 + $0xb] sm:$0x1]  }
   0x2   :  { %7 = vrot.lane.b32.xlu0 %v101_v0, %s131_s10  ;;  %19 = vrot.lane.b32.xlu1 %v103_v1, %s132_s11  ;;  %s133_s14 = smov 88   ;;  %v102_v3 = vld [vmem:[%s207_s0 + $0xe] sm:$0x1]   ;;  %v104_v4 = vld [vmem:[%s207_s0 + $0xc] sm:$0x1]   ;;  %s134_s19 = smov 112  }
   0x3   :  { %31 = vrot.lane.b32.xlu2 %v105_v2, %s133_s14  ;;  %s135_s20 = smov 96   ;;  %v106_v5 = vld [vmem:[%s207_s0 + $0xa] sm:$0x1]   ;;  %s136_s23 = smov 80   ;;  %v107_v6 = vld [vmem:[%s207_s0 + $0x9] sm:$0x1]  }
   0x4   :  { %v108_v7 = vld [vmem:[%s207_s0 + $0x8] sm:$0x1]   ;;  %s137_s28 = smov 72   ;;  %s138_s29 = smov 64   ;;  %v109_v8 = vld [vmem:[%s207_s0 + $0x7] sm:$0x1]  }
   0x5   :  { %s139_s3 = smov 56   ;;  %v110_v9 = vld [vmem:[%s207_s0 + $0x6] sm:$0x1]   ;;  %v111_v10 = vld [vmem:[%s207_s0 + $0x5] sm:$0x1]   ;;  %s140_s8 = smov 48  }
   0x6   :  { %s141_s9 = smov 40   ;;  %v112_v11 = vld [vmem:[%s207_s0 + $0x4] sm:$0x1]   ;;  %s142_s12 = smov 32   ;;  %v113_v12 = vld [vmem:[%s207_s0 + $0x3] sm:$0x1]  }
   0x7   :  { %v114_v13 = vld [vmem:[%s207_s0 + $0x2] sm:$0x1]   ;;  %s143_s17 = smov 24   ;;  %s144_s18 = smov 16   ;;  %v115_v14 = vld [vmem:[%s207_s0 + $0x1] sm:$0x1]  }
   0x8   :  { %s145_s21 = smov 8   ;;  %v2_v15 = vld [vmem:[%s207_s0] sm:$0x1]   ;;  %vm27_vm4 = vcmask 851712   ;;  %vm33_vm5 = vcmask 786112   ;;  %vm39_vm6 = vcmask 720512  }
   0x9   :  { %4 = vst.msk [vmem:[#allocation0] sm:$0x1] %vm3_vm0, %v2_v15   ;;  %vm45_vm7 = vcmask 654912   ;;  %vm51_vm8 = vcmask 589312   ;;  %vm57_vm9 = vcmask 523712   ;;  %vm63_vm10 = vcmask 458112  }
   0xa   :  { %13 = vrot.lane.b32.xlu0 %v102_v3, %s134_s19  ;;  %25 = vrot.lane.b32.xlu1 %v104_v4, %s135_s20  ;;  %vm69_vm11 = vcmask 392512   ;;  %vm75_vm12 = vcmask 326912   ;;  %vm81_vm13 = vcmask 261312   ;;  %vm87_vm14 = vcmask 195712  }
   0xb   :  { %37 = vrot.lane.b32.xlu2 %v106_v5, %s136_s23  ;;  %vm93_vm15 = vcmask 130112  }
  0x12   :  { %43 = vrot.lane.b32.xlu0 %v107_v6, %s137_s28  ;;  %49 = vrot.lane.b32.xlu1 %v108_v7, %s138_s29 }
  0x13   :  { %55 = vrot.lane.b32.xlu2 %v109_v8, %s139_s3 }
  0x1a   :  { %61 = vrot.lane.b32.xlu0 %v110_v9, %s140_s8  ;;  %67 = vrot.lane.b32.xlu1 %v111_v10, %s141_s9 }
  0x1b   :  { %73 = vrot.lane.b32.xlu2 %v112_v11, %s142_s12 }
  0x22   :  { %79 = vrot.lane.b32.xlu0 %v113_v12, %s143_s17  ;;  %85 = vrot.lane.b32.xlu1 %v114_v13, %s144_s18 }
  0x23   :  { %91 = vrot.lane.b32.xlu2 %v115_v14, %s145_s21 }
  0x5d   :  { %v32_v16 = vpop.permute.xlu2 %31  }
  0x65   :  { %v38_v17 = vpop.permute.xlu2 %37  }
  0x6d   :  { %v56_v18 = vpop.permute.xlu2 %55  }
  0x74   :  { %v8_v19 = vpop.permute.xlu0 %7   ;;  %v20_v20 = vpop.permute.xlu1 %19  }
  0x75   :  { %10 = vst.msk [vmem:[#allocation0] sm:$0x1] %vm9_vm1, %v8_v19   ;;  %v74_v21 = vpop.permute.xlu2 %73  }
  0x7c   :  { %v14_v22 = vpop.permute.xlu0 %13   ;;  %v26_v23 = vpop.permute.xlu1 %25  }
  0x7d   :  { %16 = vst.msk [vmem:[#allocation0] sm:$0x1] %vm15_vm2, %v14_v22   ;;  %v92_v24 = vpop.permute.xlu2 %91  }
  0x7e   :  { %22 = vst.msk [vmem:[#allocation0] sm:$0x1] %vm21_vm3, %v20_v20  }
  0x7f   :  { %28 = vst.msk [vmem:[#allocation0] sm:$0x1] %vm27_vm4, %v26_v23  }
  0x80   :  { %34 = vst.msk [vmem:[#allocation0] sm:$0x1] %vm33_vm5, %v32_v16  }
  0x81   :  { %40 = vst.msk [vmem:[#allocation0] sm:$0x1] %vm39_vm6, %v38_v17  }
  0x84   :  { %v44_v25 = vpop.permute.xlu0 %43   ;;  %v50_v26 = vpop.permute.xlu1 %49  }
  0x85   :  { %46 = vst.msk [vmem:[#allocation0] sm:$0x1] %vm45_vm7, %v44_v25  }
  0x86   :  { %52 = vst.msk [vmem:[#allocation0] sm:$0x1] %vm51_vm8, %v50_v26  }
  0x87   :  { %58 = vst.msk [vmem:[#allocation0] sm:$0x1] %vm57_vm9, %v56_v18  }
  0x8c   :  { %v62_v27 = vpop.permute.xlu0 %61   ;;  %v68_v28 = vpop.permute.xlu1 %67  }
  0x8d   :  { %64 = vst.msk [vmem:[#allocation0] sm:$0x1] %vm63_vm10, %v62_v27  }
  0x8e   :  { %70 = vst.msk [vmem:[#allocation0] sm:$0x1] %vm69_vm11, %v68_v28  }
  0x8f   :  { %76 = vst.msk [vmem:[#allocation0] sm:$0x1] %vm75_vm12, %v74_v21  }
  0x94   :  { %v80_v29 = vpop.permute.xlu0 %79   ;;  %v86_v30 = vpop.permute.xlu1 %85  }
  0x95   :  { %82 = vst.msk [vmem:[#allocation0] sm:$0x1] %vm81_vm13, %v80_v29  }
  0x96   :  { %88 = vst.msk [vmem:[#allocation0] sm:$0x1] %vm87_vm14, %v86_v30  }
  0x97   :  { %94 = vst.msk [vmem:[#allocation0] sm:$0x1] %vm93_vm15, %v92_v24  }
  0x9e   :  { %v97_v31 = vld [vmem:[#allocation0] sm:$0x1] }
  0x9f   :  { %100 = vst [vmem:[%s208_s1] sm:$0x1] %v97_v31 }

// kernel: residual_block_forward.3
= control target key start
LH: loop header
LB: loop body
LE: loop exit
PB: predicated region body
PF: predicated region fallthrough
CT: control target
= control target key end

     0   :  { %s537_s12 = smov 0   ;;  %s717_s0 = inlined_call_operand.vmem [shape: f32[2,16,64], index: 0, kind: input, shape index: {}]   ;;  %s718_s1 = inlined_call_operand.vmem [shape: f32[192,256], index: 1, kind: input, shape index: {}]   ;;  %s719_s2 = inlined_call_operand.vmem [shape: f32[2,16,128], index: 2, kind: output, shape index: {0}]   ;;  %s720_s3 = inlined_call_operand.vmem [shape: f32[2,4,128], index: 3, kind: output, shape index: {1}]  }
   0x1 LB: > { %s479_s13 = sadd.s32 4294967295, %s513_s12   ;;  %p483_p0 = scmp.ge.s32.totalorder %s513_s12, 1  ;;  %s513_s12 = sphi %s537_s12, %s14_s12  }
   0x2   : > { %p140_p1 = scmp.lt.s32.totalorder %s513_s12, 3 }
   0x4   : > { %p141_p2 = pnand %p483_p0, %p140_p1 }
   0x5   : > { %p168_p3 = scmp.lt.s32.totalorder (!%p141_p2), %s479_s13, 1  ;;  %s515_s25 = smov (!%p141_p2), 64  }
   0x6   : > { %144 = sbr.rel (%p141_p2) target bundleno = 301 (0x12d), region = 28 }
   0xb   : > { %v236_v0 = vld [vmem:[%s718_s1 + $0xf0] sm:$0xff]  ;;  %v237_v1 = vld [vmem:[%s718_s1 + $0xf8] sm:$0xff]  ;;  %v234_v2 = vld [vmem:[%s718_s1 + $0xe0] sm:$0xff]  ;;  %s722_s13 = smov (!%p168_p3, %s479_s13), 1  ;;  %vm187_vm0 = vcmask 523264   ;;  %vm182_vm1 = vcmask 516096  }
   0xc   : > { %260 = vmatpush.msra.mxu0 %v236_v0  ;;  %306 = vmatpush.msra.mxu2 %v237_v1  ;;  %v235_v3 = vld [vmem:[%s718_s1 + $0xe8] sm:$0xff]  ;;  %v232_v4 = vld [vmem:[%s718_s1 + $0xd0] sm:$0xff]  ;;  %v233_v5 = vld [vmem:[%s718_s1 + $0xd8] sm:$0xff]  ;;  %s495_s26 = sshll.u32 %s722_s13, 4  ;;  %v516_v48 = vmov 0.0   ;;  %vm384_vm2 = vcmask 1040384  }
   0xd   : > { %v230_v6 = vld [vmem:[%s718_s1 + $0xc0] sm:$0xff]  ;;  %v231_v7 = vld [vmem:[%s718_s1 + $0xc8] sm:$0xff]  ;;  %s172_s6 = scalar_lea.vmem %s717_s0, %s495_s26  ;;  %v228_v8 = vld [vmem:[%s718_s1 + $0xb0] sm:$0xff]  ;;  %183 = vst.msk [vmem:[#allocation2] sm:$0x1] %vm182_vm1, %v516_v48  ;;  %s177_s20 = scalar_lea.vmem %s719_s2, %s495_s26  ;;  %vm386_vm3 = vcmask 1041408  }
   0xe   : > { %261 = vmatpush.msra.mxu0 %v234_v2  ;;  %307 = vmatpush.msra.mxu2 %v235_v3  ;;  %v252_v9 = vld [vmem:[%s718_s1 + $0x170] sm:$0xff]  ;;  %v185_v10 = vld [vmem:[%s172_s6] sm:$0xff]  ;;  %v186_v11 = vld [vmem:[%s172_s6 + $0x8] sm:$0xff]  ;;  %184 = vst.msk [vmem:[#allocation2 + $0x11] sm:$0x1] %vm182_vm1, %v516_v48  ;;  %s488_s26 = sshll.u32 %s722_s13, 2 }
   0xf   : > { %v229_v12 = vld [vmem:[%s718_s1 + $0xb8] sm:$0xff]  ;;  %291 = vmatpush.msra.mxu1 %v252_v9  ;;  %188 = vst.msk [vmem:[#allocation2 + $0x1] sm:$0xff] %vm187_vm0, %v185_v10  ;;  %v250_v14 = vld [vmem:[%s718_s1 + $0x160] sm:$0xff]  ;;  %v227_v16 = vld [vmem:[%s718_s1 + $0xa8] sm:$0xff]  ;;  %vm388_vm4 = vcmask 1042432   ;;  %s181_s23 = scalar_lea.vmem %s720_s3, %s488_s26 }
  0x10   : > { %262 = vmatpush.msra.mxu0 %v232_v4  ;;  %308 = vmatpush.msra.mxu2 %v233_v5  ;;  %v253_v13 = vld [vmem:[%s718_s1 + $0x178] sm:$0xff]  ;;  %189 = vst.msk [vmem:[#allocation2 + $0x9] sm:$0xff] %vm187_vm0, %v186_v11  ;;  %v226_v15 = vld [vmem:[%s718_s1 + $0xa0] sm:$0xff]  ;;  %v251_v17 = vld [vmem:[%s718_s1 + $0x168] sm:$0xff] }
  0x11   : > { %337 = vmatpush.msra.mxu3 %v253_v13  ;;  %292 = vmatpush.msra.mxu1 %v250_v14  ;;  %v248_v18 = vld [vmem:[%s718_s1 + $0x150] sm:$0xff]  ;;  %v249_v19 = vld [vmem:[%s718_s1 + $0x158] sm:$0xff]  ;;  %v246_v22 = vld [vmem:[%s718_s1 + $0x140] sm:$0xff] }
  0x12   : > { %263 = vmatpush.msra.mxu0 %v230_v6  ;;  %309 = vmatpush.msra.mxu2 %v231_v7  ;;  %v224_v20 = vld [vmem:[%s718_s1 + $0x90] sm:$0xff]  ;;  %v225_v21 = vld [vmem:[%s718_s1 + $0x98] sm:$0xff]  ;;  %v247_v23 = vld [vmem:[%s718_s1 + $0x148] sm:$0xff] }
  0x13   : > { %338 = vmatpush.msra.mxu3 %v251_v17  ;;  %293 = vmatpush.msra.mxu1 %v248_v18  ;;  %v244_v24 = vld [vmem:[%s718_s1 + $0x130] sm:$0xff]  ;;  %v222_v25 = vld [vmem:[%s718_s1 + $0x80] sm:$0xff]  ;;  %v223_v26 = vld [vmem:[%s718_s1 + $0x88] sm:$0xff] }
  0x14   : > { %264 = vmatpush.msra.mxu0 %v228_v8  ;;  %310 = vmatpush.msra.mxu2 %v229_v12  ;;  %v245_v27 = vld [vmem:[%s718_s1 + $0x138] sm:$0xff]  ;;  %v220_v29 = vld [vmem:[%s718_s1 + $0x70] sm:$0xff]  ;;  %v242_v30 = vld [vmem:[%s718_s1 + $0x120] sm:$0xff] }
  0x15   : > { %339 = vmatpush.msra.mxu3 %v249_v19  ;;  %294 = vmatpush.msra.mxu1 %v246_v22  ;;  %v221_v31 = vld [vmem:[%s718_s1 + $0x78] sm:$0xff]  ;;  %v243_v32 = vld [vmem:[%s718_s1 + $0x128] sm:$0xff]  ;;  %v218_v33 = vld [vmem:[%s718_s1 + $0x60] sm:$0xff] }
  0x16   : > { %265 = vmatpush.msra.mxu0 %v226_v15  ;;  %311 = vmatpush.msra.mxu2 %v227_v16  ;;  %v192_v28 = vld [vmem:[#allocation2 + $0x1] sm:$0xff]  ;;  %v240_v34 = vld [vmem:[%s718_s1 + $0x110] sm:$0xff]  ;;  %v241_v36 = vld [vmem:[%s718_s1 + $0x118] sm:$0xff] }
  0x17   : > { %340 = vmatpush.msra.mxu3 %v247_v23  ;;  %295 = vmatpush.msra.mxu1 %v244_v24  ;;  %v219_v35 = vld [vmem:[%s718_s1 + $0x68] sm:$0xff]  ;;  %v216_v37 = vld [vmem:[%s718_s1 + $0x50] sm:$0xff]  ;;  %v217_v38 = vld [vmem:[%s718_s1 + $0x58] sm:$0xff] }
  0x18   : > { %266 = vmatpush.msra.mxu0 %v224_v20  ;;  %312 = vmatpush.msra.mxu2 %v225_v21  ;;  %v193_v39 = vld [vmem:[#allocation2 + $0x9] sm:$0xff]  ;;  %v214_v40 = vld [vmem:[%s718_s1 + $0x40] sm:$0xff]  ;;  %v213_v43 = vld [vmem:[%s718_s1 + $0x38] sm:$0xff] }
  0x19   : > { %198 = vrot.lane.b32.xlu0 %v192_v28, %s515_s25  ;;  %341 = vmatpush.msra.mxu3 %v245_v27  ;;  %v215_v41 = vld [vmem:[%s718_s1 + $0x48] sm:$0xff]  ;;  %v212_v42 = vld [vmem:[%s718_s1 + $0x30] sm:$0xff]  ;;  %v210_v44 = vld [vmem:[%s718_s1 + $0x20] sm:$0xff] }
  0x1a   : > { %267 = vmatpush.msra.mxu0 %v222_v25  ;;  %313 = vmatpush.msra.mxu2 %v223_v26  ;;  %v211_v45 = vld [vmem:[%s718_s1 + $0x28] sm:$0xff]  ;;  %v208_v46 = vld [vmem:[%s718_s1 + $0x10] sm:$0xff]  ;;  %v209_v47 = vld [vmem:[%s718_s1 + $0x18] sm:$0xff] }
  0x1b   : > { %296 = vmatpush.msra.mxu1 %v242_v30  ;;  %342 = vmatpush.msra.mxu3 %v243_v32  ;;  %v206_v49 = vld [vmem:[%s718_s1] sm:$0xff]  ;;  %v207_v51 = vld [vmem:[%s718_s1 + $0x8] sm:$0xff] }
  0x1c   : > { %268 = vmatpush.msra.mxu0 %v220_v29  ;;  %314 = vmatpush.msra.mxu2 %v221_v31  ;;  %v238_v50 = vld [vmem:[%s718_s1 + $0x100] sm:$0xff]  ;;  %v239_v52 = vld [vmem:[%s718_s1 + $0x108] sm:$0xff] }
  0x1d   : > { %297 = vmatpush.msra.mxu1 %v240_v34  ;;  %343 = vmatpush.msra.mxu3 %v241_v36  ;;  %v194_v53 = vld [vmem:[#allocation2 + $0x2] sm:$0xff]  ;;  %v195_v54 = vld [vmem:[#allocation2 + $0xa] sm:$0xff] }
  0x1e   : > { %269 = vmatpush.msra.mxu0 %v218_v33  ;;  %315 = vmatpush.msra.mxu2 %v219_v35  ;;  %v190_v55 = vld [vmem:[#allocation2] sm:$0xff]  ;;  %v191_v58 = vld [vmem:[#allocation2 + $0x8] sm:$0xff] }
  0x1f   : > { %298 = vmatpush.msra.mxu1 %v238_v50  ;;  %344 = vmatpush.msra.mxu3 %v239_v52 }
  0x20   : > { %270 = vmatpush.msra.mxu0 %v216_v37  ;;  %316 = vmatpush.msra.mxu2 %v217_v38 }
  0x21   : > { %200 = vrot.lane.b32.xlu0 %v193_v39, %s515_s25  ;;  %489 = vmatmul.msk.f32.vlgmr.msra.gmra.mxu1 %vm187_vm0, %v194_v53 }
  0x22   : > { %271 = vmatpush.msra.mxu0 %v214_v40  ;;  %317 = vmatpush.msra.mxu2 %v215_v41 }
  0x23   : > { %491 = vmatmul.msk.f32.vlgmr.msra.gmra.mxu3 %vm187_vm0, %v194_v53 }
  0x24   : > { %272 = vmatpush.msra.mxu0 %v212_v42  ;;  %318 = vmatpush.msra.mxu2 %v213_v43 }
  0x26   : > { %273 = vmatpush.msra.mxu0 %v210_v44  ;;  %319 = vmatpush.msra.mxu2 %v211_v45 }
  0x28   : > { %274 = vmatpush.msra.mxu0 %v208_v46  ;;  %320 = vmatpush.msra.mxu2 %v209_v47 }
  0x29   : > { %490 = vmatmul.msk.f32.gmra.mxu1 %vm187_vm0, %v195_v54 }
  0x2a   : > { %275 = vmatpush.msra.mxu0 %v206_v49  ;;  %321 = vmatpush.msra.mxu2 %v207_v51 }
  0x2b   : > { %492 = vmatmul.msk.f32.gmra.mxu3 %vm187_vm0, %v195_v54 }
  0x8b   : > { %v199_v56 = vpop.permute.xlu0 %198 }
  0x8c   : > { %v204_v57 = vsel %vm187_vm0, %v190_v55, %v199_v56 }
  0x8d   : > { %276 = vmatmul.f32.vlgmr.msra.gmra.mxu0 %v204_v57  ;;  %322 = vmatmul.f32.vlgmr.msra.gmra.mxu2 %v204_v57 }
  0x93   : > { %v201_v59 = vpop.permute.xlu0 %200 }
  0x94   : > { %v205_v60 = vsel %vm187_vm0, %v191_v58, %v201_v59 }
  0x95   : > { %279 = vmatmul.f32.gmra.mxu0 %v205_v60  ;;  %325 = vmatmul.f32.gmra.mxu2 %v205_v60 }
  0x9e   : > { %v300_v61 = vpop.f32.mrf.mxu1 }
  0xa6   : > { %v346_v0 = vpop.f32.mrf.mxu3  ;;  %v303_v2 = vpop.f32.mrf.mxu1 }
  0xae   : > { %v349_v9 = vpop.f32.mrf.mxu3 }
 0x10a   : > { %v277_v62 = vpop.f32.mrf.mxu0 }
 0x10b   : > { %v301_v63 = vadd.f32 %v300_v61, %v277_v62 }
 0x10d   : > { %391 = vst [vmem:[%s177_s20] sm:$0xff] %v301_v63  ;;  %v359_v5 = vmul.f32 %v301_v63, %v301_v63 }
 0x110   : > { %v323_v1 = vpop.f32.mrf.mxu2 }
 0x111   : > { %v347_v8 = vadd.f32 %v346_v0, %v323_v1 }
 0x112   : > { %v280_v3 = vpop.f32.mrf.mxu0 }
 0x113   : > { %v304_v4 = vadd.f32 %v303_v2, %v280_v3  ;;  %v375_v16 = vmul.f32 %v347_v8, %v347_v8 }
 0x115   : > { %v352_v6 = vadd.f32 %v304_v4, %v301_v63  ;;  %v360_v7 = vmul.f32 %v304_v4, %v304_v4  ;;  %392 = vst [vmem:[%s177_s20 + $0x8] sm:$0xff] %v304_v4 }
 0x117   : > { %v353_v10 = vrot.slane %v352_v6, 4  ;;  %v361_v11 = vadd.f32 %v360_v7, %v359_v5 }
 0x118   : > { %v326_v12 = vpop.f32.mrf.mxu2 }
 0x119   : > { %v354_v13 = vadd.f32 %v353_v10, %v352_v6  ;;  %v362_v14 = vrot.slane %v361_v11, 4  ;;  %v350_v15 = vadd.f32 %v349_v9, %v326_v12 }
 0x11b   : > { %v355_v17 = vrot.slane %v354_v13, 2  ;;  %v363_v18 = vadd.f32 %v362_v14, %v361_v11  ;;  %v368_v19 = vadd.f32 %v350_v15, %v347_v8  ;;  %v376_v20 = vmul.f32 %v350_v15, %v350_v15 }
 0x11d   : > { %v364_v21 = vrot.slane %v363_v18, 2  ;;  %v369_v22 = vrot.slane %v368_v19, 4  ;;  %v377_v23 = vadd.f32 %v376_v20, %v375_v16  ;;  %v356_v24 = vadd.f32 %v355_v17, %v354_v13 }
 0x11f   : > { %v365_v25 = vadd.f32 %v364_v21, %v363_v18  ;;  %v370_v26 = vadd.f32 %v369_v22, %v368_v19  ;;  %v378_v27 = vrot.slane %v377_v23, 4  ;;  %v357_v31 = vrot.slane %v356_v24, 1 }
 0x121   : > { %v366_v28 = vrot.slane %v365_v25, 1  ;;  %v371_v29 = vrot.slane %v370_v26, 2  ;;  %v379_v30 = vadd.f32 %v378_v27, %v377_v23  ;;  %v358_v37 = vadd.f32 %v357_v31, %v356_v24 }
 0x123   : > { %v372_v32 = vadd.f32 %v371_v29, %v370_v26  ;;  %v380_v33 = vrot.slane %v379_v30, 2  ;;  %v367_v34 = vadd.f32 %v366_v28, %v365_v25 }
 0x125   : > { %v373_v35 = vrot.slane %v372_v32, 1  ;;  %v381_v36 = vadd.f32 %v380_v33, %v379_v30  ;;  %v385_v40 = vsel %vm384_vm2, %v358_v37, %v367_v34 }
 0x127   : > { %v374_v38 = vadd.f32 %v373_v35, %v372_v32  ;;  %v382_v39 = vrot.slane %v381_v36, 1 }
 0x129   : > { %v383_v41 = vadd.f32 %v382_v39, %v381_v36  ;;  %v387_v42 = vsel %vm386_vm3, %v385_v40, %v374_v38 }
 0x12b   : > { %v389_v43 = vsel %vm388_vm4, %v387_v42, %v383_v41 }
 0x12c   : > { %390 = vst [vmem:[%s181_s23] sm:$0xf] %v389_v43 }
 0x12d PF: > { %s14_s12 = sadd.s32 1, %s513_s12  }
 0x12e   : > { %p11_p4 = scmp.ge.s32.totalorder %s14_s12, 4  }
 0x130   :  { %13 = sbr.rel (!%p11_p4) target bundleno = 1 (0x1), region = 70 }

// kernel: residual_block_forward.4
= control target key start
LH: loop header
LB: loop body
LE: loop exit
PB: predicated region body
PF: predicated region fallthrough
CT: control target
= control target key end

     0   :  { %s566_s18 = smov 0   ;;  %s750_s0 = inlined_call_operand.vmem [shape: f32[2,16,128], index: 0, kind: input, shape index: {}]   ;;  %s751_s1 = inlined_call_operand.vmem [shape: f32[1,128], index: 1, kind: input, shape index: {}]   ;;  %s752_s2 = inlined_call_operand.vmem [shape: f32[1,128], index: 2, kind: input, shape index: {}]   ;;  %s753_s3 = inlined_call_operand.vmem [shape: f32[384,128], index: 3, kind: input, shape index: {}]   ;;  %s754_s4 = inlined_call_operand.vmem [shape: f32[2,16,128], index: 4, kind: output, shape index: {0}]   ;;  %s755_s5 = inlined_call_operand.vmem [shape: f32[2,2,128], index: 5, kind: output, shape index: {1}]  }
   0x1 LB: > { %s486_s19 = sadd.s32 4294967295, %s533_s18   ;;  %p490_p0 = scmp.ge.s32.totalorder %s533_s18, 1  ;;  %s533_s18 = sphi %s566_s18, %s16_s18  }
   0x2   : > { %p190_p1 = scmp.lt.s32.totalorder %s533_s18, 3 }
   0x4   : > { %p191_p2 = pnand %p490_p0, %p190_p1 }
   0x5   : > { %p583_p3 = scmp.lt.s32.totalorder (!%p191_p2), %s486_s19, 1 }
   0x6   : > { %194 = sbr.rel (%p191_p2) target bundleno = 203 (0xcb), region = 36 }
   0xb   : > { %v309_v0 = vld [vmem:[%s753_s3 + $0x178] sm:$0xff]  ;;  %v308_v1 = vld [vmem:[%s753_s3 + $0x170] sm:$0xff]  ;;  %v535_v5 = vmov 0.0   ;;  %v307_v6 = vld [vmem:[%s753_s3 + $0x168] sm:$0xff]  ;;  %s758_s19 = smov (!%p583_p3, %s486_s19), 1  ;;  %vm395_vm0 = vcmask 1040384  }
   0xc   : > { %v277_v2 = vld [vmem:[%s753_s3 + $0x78] sm:$0xff]  ;;  %356 = vmatpush.msra.mxu2 %v309_v0  ;;  %v276_v4 = vld [vmem:[%s753_s3 + $0x70] sm:$0xff]  ;;  %252 = vst [vmem:[#allocation2] sm:$0x1] %v535_v5  ;;  %v275_v8 = vld [vmem:[%s753_s3 + $0x68] sm:$0xff]  ;;  %s498_s7 = sshll.u32 %s758_s19, 4 }
   0xd   : > { %310 = vmatpush.msra.mxu0 %v277_v2  ;;  %v293_v3 = vld [vmem:[%s753_s3 + $0xf8] sm:$0xff]  ;;  %500 = vmatpush.msra.mxu3 %v277_v2  ;;  %v292_v7 = vld [vmem:[%s753_s3 + $0xf0] sm:$0xff]  ;;  %253 = vst [vmem:[#allocation2 + $0x11] sm:$0x1] %v535_v5  ;;  %v291_v9 = vld [vmem:[%s753_s3 + $0xe8] sm:$0xff]  ;;  %s226_s20 = scalar_lea.vmem %s750_s0, %s498_s7  ;;  %s231_s13 = scalar_lea.vmem %s754_s4, %s498_s7 }
   0xe   : > { %333 = vmatpush.msra.mxu1 %v293_v3  ;;  %357 = vmatpush.msra.mxu2 %v308_v1  ;;  %v306_v10 = vld [vmem:[%s753_s3 + $0x160] sm:$0xff]  ;;  %v305_v13 = vld [vmem:[%s753_s3 + $0x158] sm:$0xff]  ;;  %v304_v16 = vld [vmem:[%s753_s3 + $0x150] sm:$0xff]  ;;  %s495_s7 = sshll.u32 %s758_s19, 1 }
   0xf   : > { %311 = vmatpush.msra.mxu0 %v276_v4  ;;  %501 = vmatpush.msra.mxu3 %v276_v4  ;;  %v274_v11 = vld [vmem:[%s753_s3 + $0x60] sm:$0xff]  ;;  %v273_v14 = vld [vmem:[%s753_s3 + $0x58] sm:$0xff]  ;;  %v272_v17 = vld [vmem:[%s753_s3 + $0x50] sm:$0xff]  ;;  %s235_s16 = scalar_lea.vmem %s755_s5, %s495_s7 }
  0x10   : > { %334 = vmatpush.msra.mxu1 %v292_v7  ;;  %358 = vmatpush.msra.mxu2 %v307_v6  ;;  %v290_v12 = vld [vmem:[%s753_s3 + $0xe0] sm:$0xff]  ;;  %v289_v15 = vld [vmem:[%s753_s3 + $0xd8] sm:$0xff]  ;;  %v288_v18 = vld [vmem:[%s753_s3 + $0xd0] sm:$0xff] }
  0x11   : > { %312 = vmatpush.msra.mxu0 %v275_v8  ;;  %502 = vmatpush.msra.mxu3 %v275_v8  ;;  %v303_v19 = vld [vmem:[%s753_s3 + $0x148] sm:$0xff]  ;;  %v302_v22 = vld [vmem:[%s753_s3 + $0x140] sm:$0xff]  ;;  %v301_v24 = vld [vmem:[%s753_s3 + $0x138] sm:$0xff] }
  0x12   : > { %335 = vmatpush.msra.mxu1 %v291_v9  ;;  %359 = vmatpush.msra.mxu2 %v306_v10  ;;  %v271_v20 = vld [vmem:[%s753_s3 + $0x48] sm:$0xff]  ;;  %v270_v23 = vld [vmem:[%s753_s3 + $0x40] sm:$0xff]  ;;  %v300_v26 = vld [vmem:[%s753_s3 + $0x130] sm:$0xff] }
  0x13   : > { %313 = vmatpush.msra.mxu0 %v274_v11  ;;  %503 = vmatpush.msra.mxu3 %v274_v11  ;;  %v287_v21 = vld [vmem:[%s753_s3 + $0xc8] sm:$0xff]  ;;  %v286_v25 = vld [vmem:[%s753_s3 + $0xc0] sm:$0xff]  ;;  %v269_v27 = vld [vmem:[%s753_s3 + $0x38] sm:$0xff] }
  0x14   : > { %336 = vmatpush.msra.mxu1 %v290_v12  ;;  %360 = vmatpush.msra.mxu2 %v305_v13  ;;  %v285_v28 = vld [vmem:[%s753_s3 + $0xb8] sm:$0xff]  ;;  %v236_v29 = vld [vmem:[%s226_s20] sm:$0xff]  ;;  %v237_v30 = vld [vmem:[%s226_s20 + $0x8] sm:$0xff] }
  0x15   : > { %314 = vmatpush.msra.mxu0 %v273_v14  ;;  %504 = vmatpush.msra.mxu3 %v273_v14  ;;  %v525_v31 = vld [vmem:[%s751_s1] ss:$0 sm:$0xff]  ;;  %v268_v32 = vld [vmem:[%s753_s3 + $0x30] sm:$0xff]  ;;  %v299_v37 = vld [vmem:[%s753_s3 + $0x128] sm:$0xff] }
  0x16   : > { %337 = vmatpush.msra.mxu1 %v289_v15  ;;  %361 = vmatpush.msra.mxu2 %v304_v16  ;;  %v526_v33 = vld [vmem:[%s752_s2] ss:$0 sm:$0xff]  ;;  %v284_v34 = vld [vmem:[%s753_s3 + $0xb0] sm:$0xff]  ;;  %v242_v35 = vmul.f32 %v525_v31, %v236_v29  ;;  %v243_v36 = vmul.f32 %v525_v31, %v237_v30  ;;  %v267_v38 = vld [vmem:[%s753_s3 + $0x28] sm:$0xff] }
  0x17   : > { %315 = vmatpush.msra.mxu0 %v272_v17  ;;  %505 = vmatpush.msra.mxu3 %v272_v17  ;;  %v283_v39 = vld [vmem:[%s753_s3 + $0xa8] sm:$0xff]  ;;  %v298_v42 = vld [vmem:[%s753_s3 + $0x120] sm:$0xff]  ;;  %v297_v47 = vld [vmem:[%s753_s3 + $0x118] sm:$0xff] }
  0x18   : > { %338 = vmatpush.msra.mxu1 %v288_v18  ;;  %362 = vmatpush.msra.mxu2 %v303_v19  ;;  %v248_v40 = vadd.f32 %v526_v33, %v242_v35  ;;  %v249_v41 = vadd.f32 %v526_v33, %v243_v36  ;;  %v266_v43 = vld [vmem:[%s753_s3 + $0x20] sm:$0xff]  ;;  %v265_v48 = vld [vmem:[%s753_s3 + $0x18] sm:$0xff]  ;;  %v296_v50 = vld [vmem:[%s753_s3 + $0x110] sm:$0xff] }
  0x19   : > { %316 = vmatpush.msra.mxu0 %v271_v20  ;;  %506 = vmatpush.msra.mxu3 %v271_v20  ;;  %v282_v44 = vld [vmem:[%s753_s3 + $0xa0] sm:$0xff]  ;;  %v281_v49 = vld [vmem:[%s753_s3 + $0x98] sm:$0xff]  ;;  %v264_v51 = vld [vmem:[%s753_s3 + $0x10] sm:$0xff] }
  0x1a   : > { %339 = vmatpush.msra.mxu1 %v287_v21  ;;  %363 = vmatpush.msra.mxu2 %v302_v22  ;;  %v250_v45 = vmax.f32 %v248_v40, 0.0  ;;  %v251_v46 = vmax.f32 %v249_v41, 0.0  ;;  %v280_v52 = vld [vmem:[%s753_s3 + $0x90] sm:$0xff]  ;;  %v295_v53 = vld [vmem:[%s753_s3 + $0x108] sm:$0xff]  ;;  %v294_v56 = vld [vmem:[%s753_s3 + $0x100] sm:$0xff] }
  0x1b   : > { %317 = vmatpush.msra.mxu0 %v270_v23  ;;  %507 = vmatpush.msra.mxu3 %v270_v23  ;;  %v263_v54 = vld [vmem:[%s753_s3 + $0x8] sm:$0xff]  ;;  %v262_v57 = vld [vmem:[%s753_s3] sm:$0xff] }
  0x1c   : > { %340 = vmatpush.msra.mxu1 %v286_v25  ;;  %364 = vmatpush.msra.mxu2 %v301_v24  ;;  %254 = vst [vmem:[#allocation2 + $0x1] sm:$0xff] %v250_v45  ;;  %v279_v55 = vld [vmem:[%s753_s3 + $0x88] sm:$0xff]  ;;  %v278_v58 = vld [vmem:[%s753_s3 + $0x80] sm:$0xff] }
  0x1d   : > { %318 = vmatpush.msra.mxu0 %v269_v27  ;;  %508 = vmatpush.msra.mxu3 %v269_v27  ;;  %255 = vst [vmem:[#allocation2 + $0x9] sm:$0xff] %v251_v46 }
  0x1e   : > { %341 = vmatpush.msra.mxu1 %v285_v28  ;;  %365 = vmatpush.msra.mxu2 %v300_v26 }
  0x1f   : > { %319 = vmatpush.msra.mxu0 %v268_v32  ;;  %509 = vmatpush.msra.mxu3 %v268_v32 }
  0x20   : > { %342 = vmatpush.msra.mxu1 %v284_v34  ;;  %366 = vmatpush.msra.mxu2 %v299_v37 }
  0x21   : > { %320 = vmatpush.msra.mxu0 %v267_v38  ;;  %510 = vmatpush.msra.mxu3 %v267_v38 }
  0x22   : > { %343 = vmatpush.msra.mxu1 %v283_v39  ;;  %367 = vmatpush.msra.mxu2 %v298_v42 }
  0x23   : > { %321 = vmatpush.msra.mxu0 %v266_v43  ;;  %511 = vmatpush.msra.mxu3 %v266_v43  ;;  %v256_v59 = vld [vmem:[#allocation2] sm:$0xff] }
  0x24   : > { %344 = vmatpush.msra.mxu1 %v282_v44  ;;  %368 = vmatpush.msra.mxu2 %v297_v47  ;;  %v260_v60 = vld [vmem:[#allocation2 + $0x2] sm:$0xff]  ;;  %v261_v62 = vld [vmem:[#allocation2 + $0xa] sm:$0xff] }
  0x25   : > { %322 = vmatpush.msra.mxu0 %v265_v48  ;;  %512 = vmatpush.msra.mxu3 %v265_v48  ;;  %v257_v61 = vld [vmem:[#allocation2 + $0x8] sm:$0xff] }
  0x26   : > { %345 = vmatpush.msra.mxu1 %v281_v49  ;;  %369 = vmatpush.msra.mxu2 %v296_v50 }
  0x27   : > { %323 = vmatpush.msra.mxu0 %v264_v51  ;;  %513 = vmatpush.msra.mxu3 %v264_v51 }
  0x28   : > { %346 = vmatpush.msra.mxu1 %v280_v52  ;;  %370 = vmatpush.msra.mxu2 %v295_v53 }
  0x29   : > { %324 = vmatpush.msra.mxu0 %v263_v54  ;;  %514 = vmatpush.msra.mxu3 %v263_v54 }
  0x2a   : > { %347 = vmatpush.msra.mxu1 %v279_v55  ;;  %371 = vmatpush.msra.mxu2 %v294_v56 }
  0x2b   : > { %325 = vmatpush.msra.mxu0 %v262_v57  ;;  %372 = vmatmul.f32.vlgmr.msra.gmra.mxu2 %v260_v60 }
  0x2c   : > { %348 = vmatpush.msra.mxu1 %v278_v58  ;;  %326 = vmatmul.f32.vlgmr.msra.gmra.mxu0 %v256_v59 }
  0x2d   : > { %349 = vmatmul.f32.vlgmr.msra.gmra.mxu1 %v250_v45  ;;  %515 = vmatpush.msra.mxu3 %v262_v57 }
  0x2e   : > { %329 = vmatmul.f32.vlgmr.msra.gmra.mxu3 %v257_v61 }
  0x33   : > { %375 = vmatmul.f32.gmra.mxu2 %v261_v62 }
  0x35   : > { %352 = vmatmul.f32.gmra.mxu1 %v251_v46 }
  0xa9   : > { %v327_v63 = vpop.f32.mrf.mxu0 }
  0xaa   : > { %v350_v0 = vpop.f32.mrf.mxu1 }
  0xab   : > { %v351_v1 = vadd.f32 %v350_v0, %v327_v63 }
  0xae   : > { %v373_v2 = vpop.f32.mrf.mxu2 }
  0xaf   : > { %v374_v3 = vadd.f32 %v373_v2, %v351_v1 }
  0xb1   : > { %398 = vst [vmem:[%s231_s13] sm:$0xff] %v374_v3  ;;  %v330_v4 = vpop.f32.mrf.mxu3  ;;  %v386_v9 = vmul.f32 %v374_v3, %v374_v3 }
  0xb2   : > { %v353_v5 = vpop.f32.mrf.mxu1 }
  0xb3   : > { %v354_v6 = vadd.f32 %v353_v5, %v330_v4 }
  0xb6   : > { %v376_v7 = vpop.f32.mrf.mxu2 }
  0xb7   : > { %v377_v8 = vadd.f32 %v376_v7, %v354_v6 }
  0xb9   : > { %v379_v10 = vadd.f32 %v377_v8, %v374_v3  ;;  %v387_v11 = vmul.f32 %v377_v8, %v377_v8  ;;  %399 = vst [vmem:[%s231_s13 + $0x8] sm:$0xff] %v377_v8 }
  0xbb   : > { %v380_v12 = vrot.slane %v379_v10, 4  ;;  %v388_v13 = vadd.f32 %v387_v11, %v386_v9 }
  0xbd   : > { %v381_v14 = vadd.f32 %v380_v12, %v379_v10  ;;  %v389_v15 = vrot.slane %v388_v13, 4 }
  0xbf   : > { %v382_v16 = vrot.slane %v381_v14, 2  ;;  %v390_v17 = vadd.f32 %v389_v15, %v388_v13 }
  0xc1   : > { %v383_v18 = vadd.f32 %v382_v16, %v381_v14  ;;  %v391_v19 = vrot.slane %v390_v17, 2 }
  0xc3   : > { %v384_v20 = vrot.slane %v383_v18, 1  ;;  %v392_v21 = vadd.f32 %v391_v19, %v390_v17 }
  0xc5   : > { %v393_v22 = vrot.slane %v392_v21, 1  ;;  %v385_v23 = vadd.f32 %v384_v20, %v383_v18 }
  0xc7   : > { %v394_v24 = vadd.f32 %v393_v22, %v392_v21 }
  0xc9   : > { %v396_v25 = vsel %vm395_vm0, %v385_v23, %v394_v24 }
  0xca   : > { %397 = vst [vmem:[%s235_s16] sm:$0x3] %v396_v25 }
  0xcb PF: > { %s16_s18 = sadd.s32 1, %s533_s18  }
  0xcc   : > { %p13_p4 = scmp.ge.s32.totalorder %s16_s18, 4  }
  0xce   :  { %15 = sbr.rel (!%p13_p4) target bundleno = 1 (0x1), region = 78 }

// kernel: residual_block_forward.5
= control target key start
LH: loop header
LB: loop body
LE: loop exit
PB: predicated region body
PF: predicated region fallthrough
CT: control target
= control target key end

     0   :  { %s524_s24 = smov 0   ;;  %s585_s0 = inlined_call_operand.vmem [shape: f32[2,16,128], index: 0, kind: input, shape index: {}]   ;;  %s586_s1 = inlined_call_operand.vmem [shape: f32[2,16,64], index: 1, kind: input, shape index: {}]   ;;  %s587_s2 = inlined_call_operand.vmem [shape: f32[64,128], index: 2, kind: input, shape index: {}]   ;;  %s588_s3 = inlined_call_operand.vmem [shape: f32[1,128], index: 3, kind: input, shape index: {}]   ;;  %s589_s4 = inlined_call_operand.vmem [shape: f32[1,128], index: 4, kind: input, shape index: {}]   ;;  %s590_s5 = inlined_call_operand.vmem [shape: f32[1,128], index: 5, kind: input, shape index: {}]   ;;  %s591_s6 = inlined_call_operand.vmem [shape: f32[1,128], index: 6, kind: input, shape index: {}]   ;;  %s592_s7 = inlined_call_operand.vmem [shape: f32[2,16,128], index: 7, kind: output, shape index: {}]  }
   0x1 LB: > { %s438_s25 = sadd.s32 4294967295, %s482_s24   ;;  %p442_p0 = scmp.ge.s32.totalorder %s482_s24, 1  ;;  %s482_s24 = sphi %s524_s24, %s17_s24  }
   0x2   : > { %p247_p1 = scmp.lt.s32.totalorder %s482_s24, 3 }
   0x4   : > { %p248_p2 = pnand %p442_p0, %p247_p1 }
   0x5   : > { %p284_p3 = scmp.lt.s32.totalorder (!%p248_p2), %s438_s25, 1 }
   0x6   : > { %251 = sbr.rel (%p248_p2) target bundleno = 163 (0xa3), region = 48 }
   0xb   : > { %v308_v0 = vld [vmem:[%s587_s2 + $0x38] sm:$0xff]  ;;  %v307_v1 = vld [vmem:[%s587_s2 + $0x30] sm:$0xff]  ;;  %v306_v2 = vld [vmem:[%s587_s2 + $0x28] sm:$0xff]  ;;  %s594_s25 = smov (!%p284_p3, %s438_s25), 1  ;;  %vm309_vm0 = vcmask 523264  }
   0xc   : > { %324 = vmatpush.msra.mxu0 %v308_v0  ;;  %456 = vmatpush.msra.mxu1 %v308_v0  ;;  %v305_v3 = vld [vmem:[%s587_s2 + $0x20] sm:$0xff]  ;;  %v304_v4 = vld [vmem:[%s587_s2 + $0x18] sm:$0xff]  ;;  %s547_s13 = sshll.u32 %s594_s25, 4  ;;  %v303_v5 = vld [vmem:[%s587_s2 + $0x10] sm:$0xff] }
   0xd   : > { %v302_v6 = vld [vmem:[%s587_s2 + $0x8] sm:$0xff]  ;;  %s293_s20 = scalar_lea.vmem %s586_s1, %s547_s13  ;;  %v301_v7 = vld [vmem:[%s587_s2] sm:$0xff]  ;;  %s288_s26 = scalar_lea.vmem %s585_s0, %s547_s13 }
   0xe   : > { %325 = vmatpush.msra.mxu0 %v307_v1  ;;  %457 = vmatpush.msra.mxu1 %v307_v1  ;;  %v299_v8 = vld [vmem:[%s293_s20] sm:$0xff]  ;;  %v300_v9 = vld [vmem:[%s293_s20 + $0x8] sm:$0xff]  ;;  %s298_s15 = scalar_lea.vmem %s592_s7, %s547_s13 }
   0xf   : > { %v472_v10 = vld [vmem:[%s588_s3] ss:$0 sm:$0xff]  ;;  %v340_v12 = vld [vmem:[%s288_s26 + $0x8] sm:$0xff] }
  0x10   : > { %326 = vmatpush.msra.mxu0 %v306_v2  ;;  %458 = vmatpush.msra.mxu1 %v306_v2  ;;  %v339_v11 = vld [vmem:[%s288_s26] sm:$0xff]  ;;  %v346_v15 = vmul.f32 %v472_v10, %v340_v12 }
  0x11   : > { %v345_v13 = vmul.f32 %v472_v10, %v339_v11  ;;  %v473_v14 = vld [vmem:[%s589_s4] ss:$0 sm:$0xff] }
  0x12   : > { %327 = vmatpush.msra.mxu0 %v305_v3  ;;  %459 = vmatpush.msra.mxu1 %v305_v3  ;;  %v474_v16 = vld [vmem:[%s590_s5] ss:$0 sm:$0xff]  ;;  %v352_v18 = vadd.f32 %v473_v14, %v346_v15 }
  0x13   : > { %v351_v17 = vadd.f32 %v473_v14, %v345_v13  ;;  %v475_v22 = vld [vmem:[%s591_s6] ss:$0 sm:$0xff] }
  0x14   : > { %328 = vmatpush.msra.mxu0 %v304_v4  ;;  %460 = vmatpush.msra.mxu1 %v304_v4 }
  0x16   : > { %329 = vmatpush.msra.mxu0 %v303_v5  ;;  %461 = vmatpush.msra.mxu1 %v303_v5 }
  0x18   : > { %330 = vmatpush.msra.mxu0 %v302_v6  ;;  %462 = vmatpush.msra.mxu1 %v302_v6 }
  0x1a   : > { %331 = vmatpush.msra.mxu0 %v301_v7  ;;  %463 = vmatpush.msra.mxu1 %v301_v7 }
  0x1b   : > { %449 = vmatmul.msk.f32.vlgmr.msra.gmra.mxu0 %vm309_vm0, %v299_v8  ;;  %450 = vmatmul.msk.f32.vlgmr.msra.gmra.mxu1 %vm309_vm0, %v300_v9 }
  0x98   : > { %v333_v19 = vpop.f32.mrf.mxu0  ;;  %v336_v20 = vpop.f32.mrf.mxu1 }
  0x99   : > { %v357_v21 = vmul.f32 %v474_v16, %v333_v19  ;;  %v358_v23 = vmul.f32 %v474_v16, %v336_v20 }
  0x9b   : > { %v359_v24 = vadd.f32 %v357_v21, %v351_v17  ;;  %v360_v25 = vadd.f32 %v358_v23, %v352_v18 }
  0x9d   : > { %v365_v26 = vadd.f32 %v475_v22, %v359_v24  ;;  %v366_v27 = vadd.f32 %v475_v22, %v360_v25 }
  0x9f   : > { %v367_v28 = vmax.f32 %v365_v26, 0.0  ;;  %v368_v29 = vmax.f32 %v366_v27, 0.0 }
  0xa1   : > { %369 = vst [vmem:[%s298_s15] sm:$0xff] %v367_v28 }
  0xa2   : > { %370 = vst [vmem:[%s298_s15 + $0x8] sm:$0xff] %v368_v29 }
  0xa3 PF: > { %s17_s24 = sadd.s32 1, %s482_s24  }
  0xa4   : > { %p14_p4 = scmp.ge.s32.totalorder %s17_s24, 4  }
  0xa6   :  { %16 = sbr.rel (!%p14_p4) target bundleno = 1 (0x1), region = 81 }

</bundles_post_ra>
